<compile_context>
chip_gen: v7x
topology: tpu7x:2x2x1
jax: 0.10.0
libtpu: 0.0.40
codegen_flags: <defaults>
</compile_context>

<pallas_src>
import functools

import jax
import jax.numpy as jnp
from jax.experimental import pallas as pl
from jax.experimental.pallas import tpu as pltpu


_LANE = 128
_SUBLANE = 8
_PIPE_VMEM_BUDGET = 16 << 20   # total double-buffered pipeline VMEM target
_OUT_BLOCK_TARGET = 4 << 20    # per-buffer output block target (lane-dense f32)


def _round_up(x, m):
    return ((x + m - 1) // m) * m


# ---------------------------------------------------------------------------
# Kernel
# ---------------------------------------------------------------------------
def _one_band_kernel(scal_ref, kx_ref, ky_ref, w_ref, out_ref, *, refine):
    """One k-tile of A(w, k) = (eta/pi) / ((w - xi(k))^2 + eta^2).

    scal_ref (SMEM, f32[6]) = [-2t, -4tp, -2tpp, mu, eta^2, eta/pi]
    kx_ref, ky_ref : (1, tk)    w_ref : (nw_pad, 1)    out_ref : (nw_pad, tk)
    """
    c2t = scal_ref[0]
    c4tp = scal_ref[1]
    c2tpp = scal_ref[2]
    mu = scal_ref[3]
    eta2 = scal_ref[4]
    eta_over_pi = scal_ref[5]

    # Dispersion: computed once per k tile, amortized over the Nw rows.
    cx = jnp.cos(kx_ref[...])                     # (1, tk)
    cy = jnp.cos(ky_ref[...])
    c2x = 2.0 * cx * cx - 1.0                     # cos(2k) via double angle (no extra EUP)
    c2y = 2.0 * cy * cy - 1.0
    xi = c2t * (cx + cy) + c4tp * (cx * cy) + c2tpp * (c2x + c2y) - mu

    diff = w_ref[...] - xi                        # (nw_pad,1) - (1,tk) -> (nw_pad,tk)
    denom = diff * diff + eta2
    r = pl.reciprocal(denom, approx=True)         # EUP slot
    if refine:                                    # one Newton step -> ~2^-24 rel err
        r = r * (2.0 - denom * r)
    out_ref[...] = eta_over_pi * r


# ---------------------------------------------------------------------------
# Wrapper
# ---------------------------------------------------------------------------
def _choose_tk(nk, nw_pad):
    """Lane-tile size: big lane-dense output blocks, bounded by an absolute
    double-buffered VMEM budget, with >= 2 grid steps when Nk allows (megacore)."""
    nk128 = _round_up(nk, _LANE)
    # Bytes per k lane across the pipeline, double-buffered:
    #   output column (nw_pad f32) + kx,ky blocks ((1,tk) padded to 8 sublanes).
    per_lane = 2 * nw_pad * 4 + 2 * 2 * _SUBLANE * 4
    # Resident (nw_pad, 1) w buffer occupies (8,128) tiles: 4 KiB per 8 rows.
    w_bytes = 2 * 4096 * pl.cdiv(nw_pad, _SUBLANE)
    budget_tk = max(_LANE, ((_PIPE_VMEM_BUDGET - w_bytes) // per_lane) // _LANE * _LANE)
    target_tk = max(_LANE, (_OUT_BLOCK_TARGET // (nw_pad * 4)) // _LANE * _LANE)
    tk = min(budget_tk, target_tk)
    if nk > _LANE:
        # Keep at least 2 grid steps so both v7x TensorCores get work.
        half = _round_up(pl.cdiv(nk, 2), _LANE)
        tk = min(tk, half)
    return min(tk, nk128)


def spectral_weight(kx, ky, w, params, *, tk=None, refine_reciprocal=True):
    """kx, ky: (Nk,); w: (Nw,); params: (5,) = [t, tp, tpp, mu, eta].
    Returns A of shape (Nw, Nk), f32."""
    nk = kx.shape[0]
    nw = w.shape[0]
    nw_pad = _round_up(max(nw, 1), _SUBLANE)

    # Free (layout-trivial) reshapes only -- no wrapper-side padding/copies.
    kx2 = kx.astype(jnp.float32).reshape(1, nk)
    ky2 = ky.astype(jnp.float32).reshape(1, nk)
    w2 = w.astype(jnp.float32).reshape(nw, 1)

    # Hoist all scalar algebra out of the kernel.
    p = params.astype(jnp.float32)
    eta = jnp.abs(p[4])
    scal = jnp.stack([-2.0 * p[0], -4.0 * p[1], -2.0 * p[2], p[3],
                      eta * eta, eta * jnp.float32(1.0 / jnp.pi)])

    if tk is None:
        tk = _choose_tk(nk, nw_pad)
    tk = max(_LANE, (int(tk) // _LANE) * _LANE)
    grid = (pl.cdiv(nk, tk),)

    # TODO(synk): very large Nw (tens of thousands) would need a second,
    # w-tiled grid axis; at realistic sizes w stays resident in VMEM.

    grid_spec = pltpu.PrefetchScalarGridSpec(
        num_scalar_prefetch=1,
        grid=grid,
        in_specs=[
            pl.BlockSpec((1, tk), lambda i, s: (0, i)),        # kx tile
            pl.BlockSpec((1, tk), lambda i, s: (0, i)),        # ky tile
            pl.BlockSpec((nw_pad, 1), lambda i, s: (0, 0)),    # w resident across tiles
        ],
        out_specs=pl.BlockSpec((nw_pad, tk), lambda i, s: (0, i)),
    )

    # per_lane already includes double-buffering; add headroom, stay <= 48 MiB.
    per_lane = 2 * nw_pad * 4 + 2 * 2 * _SUBLANE * 4
    tile_bytes = tk * per_lane + 2 * 4096 * pl.cdiv(nw_pad, _SUBLANE)
    vmem_limit = int(min(48 << 20, max(32 << 20, tile_bytes + (8 << 20))))

    cost = pl.CostEstimate(
        flops=7 * nw_pad * nk + 12 * nk,
        transcendentals=nw_pad * nk + 2 * nk,
        bytes_accessed=4 * (nw * nk + 2 * nk + nw),
    )

    out = pl.pallas_call(
        functools.partial(_one_band_kernel, refine=refine_reciprocal),
        out_shape=jax.ShapeDtypeStruct((nw, nk), jnp.float32),
        grid_spec=grid_spec,
        compiler_params=pltpu.CompilerParams(
            dimension_semantics=("parallel",),
            vmem_limit_bytes=vmem_limit),
        cost_estimate=cost,
    )(scal, kx2, ky2, w2)
    return out


class DifferentiableOneBand:
    """JAX mirror of Differentiable_one_band (deterministic synthetic params)."""

    def __init__(self, t=1.0, tp=-0.3, tpp=0.2, mu=-0.8, eta=0.5):
        self.params = jnp.array([t, tp, tpp, mu, eta], dtype=jnp.float32)

    def forward(self, kx, ky, w):
        return spectral_weight(kx, ky, w, self.params)


def _reference(kx, ky, w, params):
    t, tp, tpp, mu, eta = [params[i] for i in range(5)]
    eta = jnp.abs(eta)
    cx, cy = jnp.cos(kx), jnp.cos(ky)
    xi = (-2.0 * t * (cx + cy) - 4.0 * tp * cx * cy
          - 2.0 * tpp * (jnp.cos(2 * kx) + jnp.cos(2 * ky)) - mu)
    diff = w[:, None] - xi[None, :]
    return (eta / jnp.pi) / (diff * diff + eta * eta)


if __name__ == "__main__":
    key = jax.random.PRNGKey(0)
    k1, k2, k3, k4 = jax.random.split(key, 4)
    model = DifferentiableOneBand()

    # Case 1: small Nw; Nk not a multiple of the 256-lane tile (ragged last
    # block, masked stores) and a grid of 2 parallel steps.
    Nk, Nw = 300, 8
    kx = jax.random.uniform(k1, (Nk,), jnp.float32, -jnp.pi, jnp.pi)
    ky = jax.random.uniform(k2, (Nk,), jnp.float32, -jnp.pi, jnp.pi)
    w = jax.random.uniform(k3, (Nw,), jnp.float32, -4.0, 4.0)
    out = model.forward(kx, ky, w)
    jax.block_until_ready(out)
    ref = _reference(kx, ky, w, model.params)
    assert out.shape == (Nw, Nk)
    assert jnp.allclose(out, ref, atol=1e-5, rtol=1e-5)

    # Case 2: larger Nw (more sublane rows per tile).
    Nw2 = 64
    w_big = jax.random.uniform(k4, (Nw2,), jnp.float32, -4.0, 4.0)
    out2 = model.forward(kx, ky, w_big)
    jax.block_until_ready(out2)
    ref2 = _reference(kx, ky, w_big, model.params)
    assert out2.shape == (Nw2, Nk)
    assert jnp.allclose(out2, ref2, atol=1e-5, rtol=1e-5)

    # Case 3: Nw not a multiple of 8 and Nk < 128 (masked sublane + lane stores).
    Nk3, Nw3 = 100, 5
    out3 = model.forward(kx[:Nk3], ky[:Nk3], w[:Nw3])
    jax.block_until_ready(out3)
    ref3 = _reference(kx[:Nk3], ky[:Nk3], w[:Nw3], model.params)
    assert out3.shape == (Nw3, Nk3)
    assert jnp.allclose(out3, ref3, atol=1e-5, rtol=1e-5)

    print("KERNEL_OK")
</pallas_src>

<mosaic_0001>
module attributes {stable_mosaic.version = 11 : i64} {
  func.func @_one_band_kernel(%arg0: i32, %arg1: memref<6xf32, #tpu.memory_space<smem>>, %arg2: memref<1x256xf32, #tpu.memory_space<vmem>>, %arg3: memref<1x256xf32, #tpu.memory_space<vmem>>, %arg4: memref<8x1xf32, #tpu.memory_space<vmem>>, %arg5: memref<8x256xf32, #tpu.memory_space<vmem>>) attributes {dimension_semantics = [#tpu.dimension_semantics<parallel>], iteration_bounds = array<i64: 2>, scalar_prefetch = 1 : i64, scratch_operands = 0 : i64, tpu.core_type = #tpu.core_type<tc>, window_params = [{transform_indices = @transform_0, window_bounds = array<i64: 1, 256>}, {transform_indices = @transform_1, window_bounds = array<i64: 1, 256>}, {pipeline_mode = #tpu.pipeline_mode<synchronous>, transform_indices = @transform_2, window_bounds = array<i64: 8, 1>}, {transform_indices = @transform_3, window_bounds = array<i64: 8, 256>}]} {
    %c0 = arith.constant 0 : index
    %0 = memref.load %arg1[%c0] : memref<6xf32, #tpu.memory_space<smem>>
    %c1 = arith.constant 1 : index
    %1 = memref.load %arg1[%c1] : memref<6xf32, #tpu.memory_space<smem>>
    %c2 = arith.constant 2 : index
    %2 = memref.load %arg1[%c2] : memref<6xf32, #tpu.memory_space<smem>>
    %c3 = arith.constant 3 : index
    %3 = memref.load %arg1[%c3] : memref<6xf32, #tpu.memory_space<smem>>
    %c4 = arith.constant 4 : index
    %4 = memref.load %arg1[%c4] : memref<6xf32, #tpu.memory_space<smem>>
    %c5 = arith.constant 5 : index
    %5 = memref.load %arg1[%c5] : memref<6xf32, #tpu.memory_space<smem>>
    %c0_0 = arith.constant 0 : index
    %c0_1 = arith.constant 0 : index
    %6 = vector.load %arg2[%c0_0, %c0_1] : memref<1x256xf32, #tpu.memory_space<vmem>>, vector<1x256xf32>
    %7 = math.cos %6 : vector<1x256xf32>
    %c0_2 = arith.constant 0 : index
    %c0_3 = arith.constant 0 : index
    %8 = vector.load %arg3[%c0_2, %c0_3] : memref<1x256xf32, #tpu.memory_space<vmem>>, vector<1x256xf32>
    %9 = math.cos %8 : vector<1x256xf32>
    %cst = arith.constant 2.000000e+00 : f32
    %10 = vector.broadcast %cst : f32 to vector<1x256xf32>
    %11 = arith.mulf %10, %7 : vector<1x256xf32>
    %12 = arith.mulf %11, %7 : vector<1x256xf32>
    %cst_4 = arith.constant 1.000000e+00 : f32
    %13 = vector.broadcast %cst_4 : f32 to vector<1x256xf32>
    %14 = arith.subf %12, %13 : vector<1x256xf32>
    %cst_5 = arith.constant 2.000000e+00 : f32
    %15 = vector.broadcast %cst_5 : f32 to vector<1x256xf32>
    %16 = arith.mulf %15, %9 : vector<1x256xf32>
    %17 = arith.mulf %16, %9 : vector<1x256xf32>
    %cst_6 = arith.constant 1.000000e+00 : f32
    %18 = vector.broadcast %cst_6 : f32 to vector<1x256xf32>
    %19 = arith.subf %17, %18 : vector<1x256xf32>
    %20 = arith.addf %7, %9 : vector<1x256xf32>
    %21 = vector.broadcast %0 : f32 to vector<1x256xf32>
    %22 = arith.mulf %21, %20 : vector<1x256xf32>
    %23 = arith.mulf %7, %9 : vector<1x256xf32>
    %24 = vector.broadcast %1 : f32 to vector<1x256xf32>
    %25 = arith.mulf %24, %23 : vector<1x256xf32>
    %26 = arith.addf %22, %25 : vector<1x256xf32>
    %27 = arith.addf %14, %19 : vector<1x256xf32>
    %28 = vector.broadcast %2 : f32 to vector<1x256xf32>
    %29 = arith.mulf %28, %27 : vector<1x256xf32>
    %30 = arith.addf %26, %29 : vector<1x256xf32>
    %31 = vector.broadcast %3 : f32 to vector<1x256xf32>
    %32 = arith.subf %30, %31 : vector<1x256xf32>
    %c0_7 = arith.constant 0 : index
    %c0_8 = arith.constant 0 : index
    %33 = vector.load %arg4[%c0_7, %c0_8] : memref<8x1xf32, #tpu.memory_space<vmem>>, vector<8x1xf32>
    %34 = vector.broadcast %33 : vector<8x1xf32> to vector<8x256xf32>
    %35 = vector.broadcast %32 : vector<1x256xf32> to vector<8x256xf32>
    %36 = arith.subf %34, %35 : vector<8x256xf32>
    %37 = arith.mulf %36, %36 : vector<8x256xf32>
    %38 = vector.broadcast %4 : f32 to vector<8x256xf32>
    %39 = arith.addf %37, %38 : vector<8x256xf32>
    %40 = tpu.reciprocal %39 {approx = true} : vector<8x256xf32> -> vector<8x256xf32>
    %41 = arith.mulf %39, %40 : vector<8x256xf32>
    %cst_9 = arith.constant 2.000000e+00 : f32
    %42 = vector.broadcast %cst_9 : f32 to vector<8x256xf32>
    %43 = arith.subf %42, %41 : vector<8x256xf32>
    %44 = arith.mulf %40, %43 : vector<8x256xf32>
    %45 = vector.broadcast %5 : f32 to vector<8x256xf32>
    %46 = arith.mulf %45, %44 : vector<8x256xf32>
    %c0_10 = arith.constant 0 : index
    %c0_11 = arith.constant 0 : index
    %47 = vector.load %arg5[%c0_10, %c0_11] : memref<8x256xf32, #tpu.memory_space<vmem>>, vector<8x256xf32>
    tpu.vector_store %arg5[%c0_10, %c0_11], %46 {strides = array<i32>} : memref<8x256xf32, #tpu.memory_space<vmem>>, vector<8x256xf32>,
    return
  }
  func.func @transform_0(%arg0: i32, %arg1: memref<6xf32, #tpu.memory_space<smem>>) -> (i32, i32) {
    %c0_i32 = arith.constant 0 : i32
    %c0_i32_0 = arith.constant 0 : i32
    return %c0_i32, %arg0 : i32, i32
  }
  func.func @transform_1(%arg0: i32, %arg1: memref<6xf32, #tpu.memory_space<smem>>) -> (i32, i32) {
    %c0_i32 = arith.constant 0 : i32
    %c0_i32_0 = arith.constant 0 : i32
    return %c0_i32, %arg0 : i32, i32
  }
  func.func @transform_2(%arg0: i32, %arg1: memref<6xf32, #tpu.memory_space<smem>>) -> (i32, i32) {
    %c0_i32 = arith.constant 0 : i32
    %c0_i32_0 = arith.constant 0 : i32
    %c0_i32_1 = arith.constant 0 : i32
    return %c0_i32, %c0_i32_0 : i32, i32
  }
  func.func @transform_3(%arg0: i32, %arg1: memref<6xf32, #tpu.memory_space<smem>>) -> (i32, i32) {
    %c0_i32 = arith.constant 0 : i32
    %c0_i32_0 = arith.constant 0 : i32
    return %c0_i32, %arg0 : i32, i32
  }
}

</mosaic_0001>

<bundles_post_ra>
// kernel: tpu_custom_call.1
= control target key start
LH: loop header
LB: loop body
LE: loop exit
PB: predicated region body
PF: predicated region fallthrough
CT: control target
= control target key end

     0   :  { %s1019_s0 = inlined_call_operand.vmem [shape: f32[6], index: 0, kind: input, shape index: {}]   ;;  %s1020_s1 = inlined_call_operand.vmem [shape: f32[1,300], index: 1, kind: input, shape index: {}]   ;;  %s1021_s2 = inlined_call_operand.vmem [shape: f32[1,300], index: 2, kind: input, shape index: {}]   ;;  %s1022_s3 = inlined_call_operand.vmem [shape: f32[8,1], index: 3, kind: input, shape index: {}]   ;;  %s1023_s4 = inlined_call_operand.hbm [shape: f32[8,300], index: 4, kind: output, shape index: {}]  }
   0x1   :  { %s9_s17 = sshll.u32 %s1019_s0, 4  ;;  %s10_s17 = int_to_ptr.vmem [resolvable:$true] %s9_s17 }
   0x2   :  { %s694_s18 = scalar_lea.vmem %s10_s17, 16  ;;  %p699_p1 = scmp.lt.s32.totalorder %s10_s17, %s10_s17 }
   0x3   :  { %p695_p0 = scmp.ne.s32.totalorder %s10_s17, %s694_s18  ;;  %p700_p2 = scmp.lt.s32.totalorder %s694_s18, %s694_s18 }
   0x5   :  { %p701_p3 = por %p700_p2, %p699_p1 }
   0x7   :  { %p702_p4 = pnand %p701_p3, %p695_p0 }
   0x9   :  { %705 = shalt.err (!%p702_p4)  }
   0xa   :  { %s772_s19 = smov [#allocation3]  }
   0xb   :  { %12 = dma.vmem_to_smem %s10_s17, 16, %s772_s19, [#allocation2] }
   0xc   :  { %750 = dma.done.wait [#allocation2], 16 }
   0xd   :  { %751 = vsyncadd [#allocation2], 4294967280 }
   0xe   :  { %14 = sfence }
   0xf   :  { %15 = vsyncpa [#allocation5], 0 }
  0x10   :  { %17 = vsyncpa [#allocation5 + $0x1], 0  ;;  %s809_s20 = smov 0   ;;  %s811_s21 = smov 0  }
  0x11   :  { %s813_s0 = smov 0   ;;  %s815_s22 = smov 0  }
  0x12 LB: > { %s830_s23 = sadd.s32 4294967295, %s770_s22   ;;  %s595_s24 = sadd.s32 4294967294, %s770_s22   ;;  %s770_s22 = sphi %s815_s22, %s1033_s22   ;;  %s766_s0 = sphi %s813_s0, %s1032_s0   ;;  %s762_s21 = sphi %s811_s21, %s1031_s21   ;;  %s758_s20 = sphi %s809_s20, %s1030_s20  }
  0x13   : > { %s834_s25 = sadd.s32 1, %s770_s22   ;;  %s103_s26 = sadd.s32 1, %s766_s0 }
  0x14   : > { %s100_s27 = ssub.s32 %s770_s22, %s834_s25  ;;  %p113_p5 = scmp.ne.s32.totalorder %s766_s0, %s762_s21 }
  0x15   : > { %p101_p6 = scmp.eq.s32.totalorder %s100_s27, 0  ;;  %p114_p7 = scmp.eq.s32.totalorder %s830_s23, 1 }
  0x16   : > { %p119_p8 = scmp.ne.s32.totalorder %s762_s21, %s758_s20  ;;  %p120_p9 = scmp.eq.s32.totalorder %s595_s24, 1 }
  0x17   : > { %s845_s28 = scalar_select %p101_p6, %s766_s0, %s103_s26  }
  0x18   : > { %p847_p10 = por %p114_p7, %p113_p5  ;;  %p851_p11 = por %p120_p9, %p119_p8 }
  0x19   : > { %p598_p12 = scmp.ge.s32.totalorder %s770_s22, 1  ;;  %p173_p13 = scmp.lt.s32.totalorder %s770_s22, 3 }
  0x1b   : > { %p174_p0 = pnand %p598_p12, %p173_p13 }
  0x1c   : > { %v472_v0 = vld [vmem:[%s1022_s3] sm:$0xff] (!%p174_p0)  ;;  %s861_s7 = sshll.u32 (!%p174_p0), %s830_s23, 1  ;;  %v773_v1 = vmov (!%p174_p0), 0   ;;  %v774_v26 = vmov (!%p174_p0), 683565275   ;;  %s205_s15 = sand.u32 (!%p174_p0), 1, %s762_s21  }
  0x1d   : > { %177 = sbr.rel (%p174_p0) target bundleno = 212 (0xd4), region = 32  ;;  %681 = vset.pattern.permute.xlu0 (!%p174_p0), %v773_v1  ;;  %p213_p1 = scmp.lt.s32.totalorder (!%p174_p0), %s861_s7, 2  ;;  %v775_v28 = vmov (!%p174_p0), 2475754826   ;;  %v776_v30 = vmov (!%p174_p0), 2131351028  }
  0x1e   : > { %475 = vperm.xlu0 (!%p174_p0), %681, %v472_v0   ;;  %v777_v32 = vmov (!%p174_p0), 2102212464   ;;  %v778_v34 = vmov (!%p174_p0), 920167782   ;;  %v779_v42 = vmov (!%p174_p0), 1326507024  }
  0x1f   : > { %s239_s16 = sld [smem:[#allocation3]] (!%p174_p0)  ;;  %s602_s17 = sld [smem:[#allocation3 + $0x1]] (!%p174_p0) }
  0x20   : > { %s603_s18 = sld [smem:[#allocation3 + $0x2]] (!%p174_p0)  ;;  %s604_s19 = sld [smem:[#allocation3 + $0x3]] (!%p174_p0) }
  0x21   : > { %s605_s24 = sld [smem:[#allocation3 + $0x4]] (!%p174_p0)  ;;  %s606_s26 = sld [smem:[#allocation3 + $0x5]] (!%p174_p0) }
  0x22   : > { %s599_s27 = sshll.u32 (!%p174_p0), %s205_s15, 4  ;;  %s965_s6 = scalar_lea.sflag (!%p174_p0), [#allocation5], %s205_s15 }
  0x23   : > { %s207_s5 = scalar_lea.vmem (!%p174_p0), [#allocation4], %s599_s27 }
  0x24   : > { %s214_s8 = scalar_select %p213_p1, %s861_s7, 2 }
  0x26   : > { %s215_s11 = scalar_lea.vmem %s1020_s1, %s214_s8  ;;  %s228_s14 = scalar_lea.vmem %s1021_s2, %s214_s8 }
  0x27   : > { %v871_v2 = vld [vmem:[%s215_s11] sm:$0x3]  ;;  %s518_s8 = ssub.s32 (%p847_p10), 3, %s861_s7 }
  0x28   : > { %v873_v3 = vld [vmem:[%s228_s14] sm:$0x3]  ;;  %v246_v4 = vand.u32 2147483647, %v871_v2  ;;  %v249_v5 = vand.u32 2139095040, %v871_v2  ;;  %vm248_vm14 = vcmp.lt.s32.totalorder %v871_v2, 0 }
  0x29   : > { %v350_v6 = vand.u32 2147483647, %v873_v3  ;;  %v353_v7 = vand.u32 2139095040, %v873_v3  ;;  %p519_p2 = scmp.lt.s32.totalorder (%p847_p10), %s518_s8, 2 }
  0x2a   : > { %v250_v8 = vshrl.u32 %v249_v5, 23  ;;  %v253_v9 = vand.u32 8388607, %v246_v4  ;;  %vm938_vm15 = vcmp.le.f32.partialorder %v246_v4, 0.7853982 }
  0x2b   : > { %v354_v10 = vshrl.u32 %v353_v7, 23  ;;  %v357_v11 = vand.u32 8388607, %v350_v6 }
  0x2c   : > { %v607_v12 = vadd.s32 4294967169, %v250_v8  ;;  %v254_v15 = vor.u32 8388608, %v253_v9 }
  0x2d   : > { %v611_v13 = vadd.s32 4294967169, %v354_v10  ;;  %v358_v16 = vor.u32 8388608, %v357_v11 }
  0x2e   : > { %v256_v14 = vadd.s32 1, %v607_v12  ;;  %v883_v22 = vshll.u32 %v254_v15, 8 }
  0x2f   : > { %v360_v17 = vadd.s32 1, %v611_v13  ;;  %v885_v24 = vshll.u32 %v358_v16, 8 }
  0x30   : > { %vm257_vm0 = vcmp.gt.s32.totalorder %v256_v14, 0 }
  0x31   : > { %v258_v18 = vsel %vm257_vm0, %v256_v14, 0  ;;  %vm361_vm1 = vcmp.gt.s32.totalorder %v360_v17, 0  ;;  %vm352_vm0 = vcmp.lt.s32.totalorder %v873_v3, 0 }
  0x32   : > { %v259_v19 = vshrl.u32 %v258_v18, 5  ;;  %v260_v20 = vand.u32 31, %v258_v18  ;;  %v362_v21 = vsel %vm361_vm1, %v360_v17, 0  ;;  %vm948_vm1 = vcmp.le.f32.partialorder %v350_v6, 0.7853982 }
  0x33   : > { %v364_v23 = vand.u32 31, %v362_v21  ;;  %v887_v36 = vshrl.u32 %v362_v21, 5 }
  0x34   : > { %v261_v25 = vsub.s32 32, %v260_v20  ;;  %v263_v27 = vshll.u32 %v774_v26, %v260_v20  ;;  %v266_v29 = vshll.u32 %v775_v28, %v260_v20  ;;  %v269_v31 = vshll.u32 %v776_v30, %v260_v20 }
  0x35   : > { %v272_v33 = vshll.u32 %v777_v32, %v260_v20  ;;  %v275_v35 = vshll.u32 %v778_v34, %v260_v20  ;;  %vm278_vm2 = vcmp.lt.s32.totalorder %v259_v19, 1  ;;  %vm279_vm3 = vcmp.lt.s32.totalorder %v259_v19, 2 }
  0x36   : > { %v262_v37 = vshrl.u32 %v774_v26, %v261_v25  ;;  %v264_v38 = vshrl.u32 %v775_v28, %v261_v25  ;;  %v267_v39 = vshrl.u32 %v776_v30, %v261_v25  ;;  %v270_v40 = vshrl.u32 %v777_v32, %v261_v25 }
  0x37   : > { %v273_v41 = vshrl.u32 %v778_v34, %v261_v25  ;;  %v276_v43 = vshrl.u32 %v779_v42, %v261_v25  ;;  %vm281_vm4 = vcmp.lt.s32.totalorder %v259_v19, 4  ;;  %v365_v47 = vsub.s32 32, %v364_v23 }
  0x38   : > { %v265_v44 = vor.u32 %v264_v38, %v263_v27  ;;  %v268_v45 = vor.u32 %v267_v39, %v266_v29  ;;  %v271_v46 = vor.u32 %v270_v40, %v269_v31  ;;  %vm280_vm5 = vcmp.lt.s32.totalorder %v259_v19, 3 }
  0x39   : > { %v274_v48 = vor.u32 %v273_v41, %v272_v33  ;;  %v277_v49 = vor.u32 %v276_v43, %v275_v35  ;;  %v367_v50 = vshll.u32 %v774_v26, %v364_v23  ;;  %v370_v58 = vshll.u32 %v775_v28, %v364_v23 }
  0x3a   : > { %v282_v51 = vsel %vm278_vm2, %v262_v37, %v265_v44  ;;  %v283_v52 = vsel %vm281_vm4, %v271_v46, 2102212464  ;;  %v286_v53 = vsel %vm278_vm2, %v265_v44, %v268_v45  ;;  %v290_v54 = vsel %vm278_vm2, %v268_v45, %v271_v46 }
  0x3b   : > { %v284_v55 = vsel %vm280_vm5, %v268_v45, %v283_v52  ;;  %v287_v56 = vsel %vm281_vm4, %v274_v48, 920167782  ;;  %v291_v57 = vsel %vm281_vm4, %v277_v49, 1326507024  ;;  %v366_v61 = vshrl.u32 %v774_v26, %v365_v47 }
  0x3c   : > { %v288_v59 = vsel %vm280_vm5, %v271_v46, %v287_v56  ;;  %v292_v60 = vsel %vm280_vm5, %v274_v48, %v291_v57  ;;  %v368_v62 = vshrl.u32 %v775_v28, %v365_v47  ;;  %v285_v63 = vsel %vm279_vm3, %v282_v51, %v284_v55 }
  0x3d   : > { %v289_v0 = vsel %vm279_vm3, %v286_v53, %v288_v59  ;;  %v293_v1 = vsel %vm279_vm3, %v290_v54, %v292_v60  ;;  %v371_v5 = vshrl.u32 %v776_v30, %v365_v47  ;;  %v373_v13 = vshll.u32 %v776_v30, %v364_v23 }
  0x3e   : > { %v900_v7 = vmul.u32.u64.low %v883_v22, %v293_v1  ;;  %v901_v8 = vmul.u32.u64.high %v883_v22, %v293_v1, %v900_v7  ;;  %v904_v9 = vmul.u32.u64.low %v883_v22, %v289_v0  ;;  %v905_v10 = vmul.u32.u64.high %v883_v22, %v289_v0, %v904_v9 }
  0x3f   : > { %v369_v11 = vor.u32 %v368_v62, %v367_v50  ;;  %v372_v12 = vor.u32 %v371_v5, %v370_v58  ;;  %v374_v14 = vshrl.u32 %v777_v32, %v365_v47  ;;  %v376_v15 = vshll.u32 %v777_v32, %v364_v23 }
  0x40   : > { %v377_v16 = vshrl.u32 %v778_v34, %v365_v47  ;;  %v379_v17 = vshll.u32 %v778_v34, %v364_v23  ;;  %v380_v18 = vshrl.u32 %v779_v42, %v365_v47  ;;  %v301_v19 = vmul.u32 %v883_v22, %v285_v63 }
  0x41   : > { %v375_v20 = vor.u32 %v374_v14, %v373_v13  ;;  %vm382_vm6 = vcmp.lt.s32.totalorder %v887_v36, 1  ;;  %vm383_vm7 = vcmp.lt.s32.totalorder %v887_v36, 2  ;;  %vm303_vm8 = vc.u32 %v901_v8, %v904_v9 }
  0x42   : > { %v304_v21 = vadd.s32 1, %v905_v10  ;;  %v378_v25 = vor.u32 %v377_v16, %v376_v15  ;;  %vm384_vm9 = vcmp.lt.s32.totalorder %v887_v36, 3  ;;  %v381_v26 = vor.u32 %v380_v18, %v379_v17 }
  0x43   : > { %vm385_vm10 = vcmp.lt.s32.totalorder %v887_v36, 4  ;;  %v386_v27 = vsel %vm382_vm6, %v366_v61, %v369_v11  ;;  %v390_v23 = vsel %vm382_vm6, %v369_v11, %v372_v12  ;;  %v394_v30 = vsel %vm382_vm6, %v372_v12, %v375_v20 }
  0x44   : > { %v305_v28 = vsel %vm303_vm8, %v304_v21, %v905_v10  ;;  %v387_v22 = vsel %vm385_vm10, %v375_v20, 2102212464  ;;  %v391_v29 = vsel %vm385_vm10, %v378_v25, 920167782  ;;  %v395_v34 = vsel %vm385_vm10, %v381_v26, 1326507024 }
  0x45   : > { %v306_v31 = vadd.s32 %v305_v28, %v301_v19  ;;  %v388_v32 = vsel %vm384_vm9, %v372_v12, %v387_v22  ;;  %v392_v33 = vsel %vm384_vm9, %v375_v20, %v391_v29  ;;  %v396_v38 = vsel %vm384_vm9, %v378_v25, %v395_v34 }
  0x46   : > { %v389_v35 = vsel %vm383_vm7, %v386_v27, %v388_v32  ;;  %v393_v37 = vsel %vm383_vm7, %v390_v23, %v392_v33  ;;  %v397_v40 = vsel %vm383_vm7, %v394_v30, %v396_v38  ;;  %v302_v59 = vadd.s32 %v904_v9, %v901_v8 }
  0x47   : > { %v307_v39 = vadd.s32 536870912, %v306_v31  ;;  %v922_v41 = vmul.u32.u64.low %v885_v24, %v393_v37  ;;  %v923_v42 = vmul.u32.u64.high %v885_v24, %v393_v37, %v922_v41  ;;  %v405_v46 = vmul.u32 %v885_v24, %v389_v35 }
  0x48   : > { %v926_v43 = vmul.u32.u64.low %v885_v24, %v397_v40  ;;  %v927_v44 = vmul.u32.u64.high %v885_v24, %v397_v40, %v926_v43  ;;  %vm338_vm5 = vweird.f32 %v871_v2  ;;  %vm442_vm9 = vweird.f32 %v873_v3 }
  0x49   : > { %v308_v45 = vshrl.u32 %v307_v39, 30  ;;  %v408_v48 = vadd.s32 1, %v923_v42 }
  0x4a   : > { %vm407_vm11 = vc.u32 %v927_v44, %v922_v41  ;;  %v406_v15 = vadd.s32 %v922_v41, %v927_v44 }
  0x4b   : > { %v309_v47 = vshll.u32 %v308_v45, 30  ;;  %v409_v36 = vsel %vm407_vm11, %v408_v48, %v923_v42  ;;  %v332_v22 = vsub.s32 4, %v308_v45 }
  0x4c   : > { %v410_v50 = vadd.s32 %v409_v36, %v405_v46 }
  0x4d   : > { %v310_v49 = vsub.s32 %v306_v31, %v309_v47  ;;  %v333_v33 = vsel %vm248_vm14, %v332_v22, %v308_v45 }
  0x4e   : > { %v411_v52 = vadd.s32 536870912, %v410_v50  ;;  %v335_v38 = vsel %vm938_vm15, 0, %v333_v33 }
  0x4f   : > { %v312_v51 = vsub.s32 0, %v310_v49  ;;  %v339_v41 = vand.u32 3, %v335_v38 }
  0x50   : > { %v412_v54 = vshrl.u32 %v411_v52, 30 }
  0x51   : > { %v608_v53 = vmin.u32 %v312_v51, %v310_v49  ;;  %vm341_vm2 = vcmp.eq.s32.totalorder %v339_v41, 0  ;;  %vm344_vm3 = vcmp.eq.s32.totalorder %v339_v41, 2  ;;  %vm340_vm4 = vcmp.lt.s32.totalorder %v339_v41, 2 }
  0x52   : > { %v413_v56 = vshll.u32 %v412_v54, 30  ;;  %v436_v37 = vsub.s32 4, %v412_v54 }
  0x53   : > { %v314_v55 = vclz %v608_v53 }
  0x54   : > { %v414_v58 = vsub.s32 %v410_v50, %v413_v56  ;;  %v437_v42 = vsel %vm352_vm0, %v436_v37, %v412_v54 }
  0x55   : > { %v609_v57 = vadd.s32 4294967294, %v314_v55  ;;  %v439_v46 = vsel %vm948_vm1, 0, %v437_v42 }
  0x56   : > { %v416_v60 = vsub.s32 0, %v414_v58  ;;  %v443_v47 = vand.u32 3, %v439_v46 }
  0x57   : > { %vm610_vm12 = vcmp.lt.s32.totalorder %v609_v57, 0 }
  0x58   : > { %v317_v24 = vsel %vm610_vm12, 0, %v609_v57  ;;  %v612_v0 = vmin.u32 %v416_v60, %v414_v58  ;;  %vm448_vm6 = vcmp.eq.s32.totalorder %v443_v47, 2  ;;  %vm445_vm7 = vcmp.eq.s32.totalorder %v443_v47, 0 }
  0x59   : > { %v318_v61 = vsub.s32 32, %v317_v24  ;;  %v319_v62 = vshll.u32 %v310_v49, %v317_v24  ;;  %v322_v63 = vsub.s32 4294967266, %v317_v24  ;;  %vm444_vm8 = vcmp.lt.s32.totalorder %v443_v47, 2 }
  0x5a   : > { %v418_v7 = vclz %v612_v0 }
  0x5b   : > { %v320_v1 = vshrl.u32 %v302_v59, %v318_v61  ;;  %v323_v5 = vadd.s32 127, %v322_v63 }
  0x5c   : > { %v613_v12 = vadd.s32 4294967294, %v418_v7 }
  0x5d   : > { %v321_v10 = vor.u32 %v320_v1, %v319_v62  ;;  %v324_v11 = vshll.u32 %v323_v5, 23  ;;  %v460_v1 = vstv %s239_s16  ;;  %v463_v5 = vstv %s602_s17 }
  0x5e   : > { %vm614_vm13 = vcmp.lt.s32.totalorder %v613_v12, 0 }
  0x5f   : > { %v325_v13 = vor.u32 4788187, %v324_v11  ;;  %v328_v14 = vcvt.s32.f32 %v321_v10  ;;  %v421_v8 = vsel %vm614_vm13, 0, %v613_v12  ;;  %v467_v11 = vstv %s603_s18 }
  0x60   : > { %v422_v9 = vsub.s32 32, %v421_v8  ;;  %v423_v17 = vshll.u32 %v414_v58, %v421_v8  ;;  %v426_v18 = vsub.s32 4294967266, %v421_v8  ;;  %v470_v8 = vstv %s604_s19 }
  0x61   : > { %v326_v16 = vand.u32 2147483647, %v325_v13 }
  0x62   : > { %v424_v20 = vshrl.u32 %v406_v15, %v422_v9  ;;  %v427_v21 = vadd.s32 127, %v426_v18 }
  0x63   : > { %v329_v19 = vmul.f32 %v328_v14, %v326_v16  ;;  %v479_v14 = vlaneseq }
  0x64   : > { %v425_v27 = vor.u32 %v424_v20, %v423_v17  ;;  %v428_v23 = vshll.u32 %v427_v21, 23 }
  0x65   : > { %v330_v26 = vxor.u32 2147483648, %v329_v19  ;;  %v480_v16 = vshrl.u32 %v479_v14, 7 }
  0x66   : > { %v429_v30 = vor.u32 4788187, %v428_v23  ;;  %v432_v31 = vcvt.s32.f32 %v425_v27  ;;  %v493_v27 = vstv %s605_s24 }
  0x67   : > { %v331_v28 = vsel %vm248_vm14, %v330_v26, %v329_v19  ;;  %v481_v17 = vsub.s32 0, %v480_v16  ;;  %v485_v18 = vsub.s32 1, %v480_v16 }
  0x68   : > { %v334_v29 = vsel %vm938_vm15, %v871_v2, %v331_v28  ;;  %v430_v32 = vand.u32 2147483647, %v429_v30 }
  0x69   : > { %682 = vcosq.f32 %v334_v29 }
  0x6a   : > { %684 = vsinq.f32 %v334_v29  ;;  %v433_v34 = vmul.f32 %v432_v31, %v430_v32 }
  0x6c   : > { %v434_v35 = vxor.u32 2147483648, %v433_v34 }
  0x6e   : > { %v435_v39 = vsel %vm352_vm0, %v434_v35, %v433_v34  ;;  %v504_v35 = vstv %s606_s26 }
  0x6f   : > { %v438_v40 = vsel %vm948_vm1, %v873_v3, %v435_v39 }
  0x70   : > { %686 = vcosq.f32 %v438_v40 }
  0x71   : > { %688 = vsinq.f32 %v438_v40 }
  0x73   : > { %v683_v43 = vpop.eup %682 }
  0x74   : > { %v685_v44 = vpop.eup %684  ;;  %v345_v45 = vxor.u32 2147483648, %v683_v43 }
  0x75   : > { %v342_v6 = vxor.u32 2147483648, %v685_v44 }
  0x76   : > { %v346_v49 = vsel %vm344_vm3, %v345_v45, %v685_v44 }
  0x77   : > { %v343_v48 = vsel %vm341_vm2, %v683_v43, %v342_v6 }
  0x78   : > { %v347_v50 = vsel %vm340_vm4, %v343_v48, %v346_v49 }
  0x79   : > { %v348_v54 = vsel %vm338_vm5, nan, %v347_v50 }
  0x7a   : > { %v687_v36 = vpop.eup %686  ;;  %v453_v59 = vmul.f32 2.0, %v348_v54 }
  0x7b   : > { %v689_v51 = vpop.eup %688  ;;  %v449_v52 = vxor.u32 2147483648, %v687_v36 }
  0x7c   : > { %v446_v53 = vxor.u32 2147483648, %v689_v51  ;;  %v454_v60 = vmul.f32 %v453_v59, %v348_v54 }
  0x7d   : > { %v450_v55 = vsel %vm448_vm6, %v449_v52, %v689_v51 }
  0x7e   : > { %v447_v56 = vsel %vm445_vm7, %v687_v36, %v446_v53  ;;  %v615_v61 = vadd.f32 -1.0, %v454_v60 }
  0x7f   : > { %v451_v57 = vsel %vm444_vm8, %v447_v56, %v450_v55 }
  0x80   : > { %v452_v58 = vsel %vm442_vm9, nan, %v451_v57 }
  0x81   : > { %v456_v24 = vmul.f32 2.0, %v452_v58  ;;  %v459_v63 = vadd.f32 %v452_v58, %v348_v54  ;;  %v462_v0 = vmul.f32 %v452_v58, %v348_v54 }
  0x83   : > { %v457_v2 = vmul.f32 %v456_v24, %v452_v58  ;;  %v461_v7 = vmul.f32 %v460_v1, %v459_v63  ;;  %v464_v10 = vmul.f32 %v463_v5, %v462_v0 }
  0x85   : > { %v616_v62 = vadd.f32 -1.0, %v457_v2  ;;  %v465_v12 = vadd.f32 %v464_v10, %v461_v7 }
  0x87   : > { %v466_v3 = vadd.f32 %v616_v62, %v615_v61 }
  0x89   : > { %v468_v13 = vmul.f32 %v467_v11, %v466_v3 }
  0x8b   : > { %v469_v15 = vadd.f32 %v468_v13, %v465_v12 }
  0x8d   : > { %v471_v9 = vsub.f32 %v469_v15, %v470_v8 }
  0x8f   : > { %v482_v19 = vrot.slane %v471_v9, %v481_v17  ;;  %v486_v20 = vrot.slane %v471_v9, %v485_v18 }
  0x9d   : > { %v476_v21 = vpop.permute.xlu0 %475 }
  0x9e   : > { %v489_v25 = vsub.f32 %v476_v21, %v482_v19  ;;  %v490_v26 = vsub.f32 %v476_v21, %v486_v20 }
  0xa0   : > { %v491_v23 = vmul.f32 %v489_v25, %v489_v25  ;;  %v492_v28 = vmul.f32 %v490_v26, %v490_v26 }
  0xa2   : > { %v494_v22 = vadd.f32 %v493_v27, %v491_v23  ;;  %v495_v29 = vadd.f32 %v493_v27, %v492_v28 }
  0xa4   : > { %690 = vrcp.f32 %v494_v22 }
  0xa5   : > { %692 = vrcp.f32 %v495_v29 }
  0xae   : > { %v691_v30 = vpop.eup %690 }
  0xaf   : > { %v693_v31 = vpop.eup %692  ;;  %v498_v32 = vmul.f32 %v691_v30, %v494_v22 }
  0xb0   : > { %v499_v33 = vmul.f32 %v693_v31, %v495_v29 }
  0xb1   : > { %v500_v34 = vsub.f32 2.0, %v498_v32 }
  0xb2   : > { %v501_v4 = vsub.f32 2.0, %v499_v33  ;;  %516 = sbr.rel (!%p847_p10) target bundleno = 212 (0xd4), region = 36 }
  0xb3   : > { %v502_v37 = vmul.f32 %v691_v30, %v500_v34 }
  0xb4   : > { %v503_v38 = vmul.f32 %v693_v31, %v501_v4 }
  0xb5   : > { %v505_v39 = vmul.f32 %v504_v35, %v502_v37 }
  0xb6   : > { %v506_v40 = vmul.f32 %v504_v35, %v503_v38 }
  0xb7   : > { %507 = vst [vmem:[%s207_s5] sm:$0xff] %v505_v39 }
  0xb8   : > { %508 = vst [vmem:[%s207_s5 + $0x8] sm:$0xff] %v506_v40 }
  0xb9   : > { %s1035_s8 = smov (!%p519_p2, %s518_s8), 2 }
  0xba   : > { %s970_s9 = sshll.u32 %s1035_s8, 7 }
  0xbb   : > { %s523_s10 = ssub.s32 256, %s970_s9 }
  0xbc   : > { %524 = vsyncadd %s965_s6, %s523_s10  ;;  %p620_p3 = scmp.ne.s32.totalorder %s970_s9, 0  ;;  %s626_s11 = sshll.u32 %s830_s23, 8 }
  0xbd   : > { %s979_s29 = scalar_lea.hbm %s1023_s4, %s626_s11  ;;  %s530_s14 = sshll.u32 %s207_s5, 4  ;;  %s531_s14 = int_to_ptr.vmem [resolvable:$true] %s530_s14 }
  0xbe   : > { %s706_s7 = scalar_lea.vmem %s531_s14, %s970_s9  ;;  %s780_s15 = smov [#allocation4]  }
  0xbf   : > { %p707_p4 = scmp.ne.s32.totalorder %s531_s14, %s706_s7  ;;  %s710_s16 = sshll.u32 %s780_s15, 4  ;;  %s711_s16 = int_to_ptr.vmem [resolvable:$false] %s710_s16 }
  0xc0   : > { %s712_s17 = scalar_lea.vmem %s711_s16, 512  ;;  %p713_p7 = scmp.lt.s32.totalorder %s531_s14, %s711_s16 }
  0xc1   : > { %p708_p5 = pnand %p707_p4, %p620_p3  ;;  %p714_p8 = scmp.lt.s32.totalorder %s712_s17, %s706_s7 }
  0xc3   : > { %p709_p6 = pneg %p708_p5  ;;  %p715_p9 = por %p714_p8, %p713_p7 }
  0xc5   : > { %p716_p10 = pnand %p715_p9, %p709_p6 }
  0xc7   : > { %719 = shalt.err (!%p716_p10)
}
  0xc8   : > { %s720_s23 = scalar_lea.hbm %s979_s29, %s970_s9  ;;  %s724_s24 = scalar_lea.hbm %s1023_s4, 384 }
  0xc9   : > { %p721_p12 = scmp.ne.s32.totalorder %s979_s29, %s720_s23  ;;  %p725_p1 = scmp.lt.u32.totalorder %s979_s29, %s1023_s4 }
  0xca   : > { %p726_p2 = scmp.lt.u32.totalorder %s724_s24, %s720_s23  ;;  %p728_p5 = scmp.lt.u32.totalorder %s720_s23, %s979_s29 }
  0xcb   : > { %p722_p13 = pnand %p721_p12, %p620_p3 }
  0xcc   : > { %p727_p4 = por %p726_p2, %p725_p1 }
  0xcd   : > { %p723_p0 = pneg %p722_p13 }
  0xce   : > { %p729_p6 = por %p728_p5, %p727_p4 }
  0xd0   : > { %p730_p7 = pnand %p729_p6, %p723_p0 }
  0xd2   : > { %733 = shalt.err (!%p730_p7)
}
  0xd3   : > { %533 = dma.vmem_to_hbm [thread:$0]  (%p620_p3), %s531_s14, %s970_s9, %s979_s29, %s965_s6  }
  0xd4 PF: > { %p640_p8 = scmp.ge.s32.totalorder %s770_s22, 2  ;;  %s542_s5 = sand.u32 1, %s758_s20  }
  0xd5   : > { %s543_s8 = scalar_lea.sflag [#allocation5], %s542_s5 }
  0xd6   : > { %p637_p9 = pnand %p640_p8, %p851_p11 }
  0xd8   : > { %753 = dma.done.wait (!%p637_p9), %s543_s8, 256  }
  0xd9   : > { %755 = vsyncadd (!%p637_p9), %s543_s8, 4294967040  ;;  %p20_p10 = scmp.ge.s32.totalorder %s834_s25, 4   ;;  %s1030_s20 = smov %s762_s21 }
  0xda   : > { %s1031_s21 = smov %s766_s0  ;;  %s1032_s0 = smov %s845_s28 }
  0xdb   : > { %s1033_s22 = smov %s834_s25  ;;  %22 = sbr.rel (!%p20_p10) target bundleno = 18 (0x12), region = 70 }
  0xe2   :  { %548 = vsyncpa [#allocation5], 1 }
  0xe3   :  { %550 = vsyncpa [#allocation5 + $0x1], 1 }

</bundles_post_ra>
